<compile_context>
chip_gen: v6e
topology: v6e:2x2x1
jax: 0.10.0
libtpu: 0.0.40
codegen_flags: <defaults>
</compile_context>

<pallas_src>
import jax
import jax.numpy as jnp
import numpy as np
from jax.experimental import pallas as pl
from jax.experimental.pallas import tpu as pltpu


def _ising_kernel(beta_ref, out_ref):
    """beta_ref: SMEM (1,) f32 = [beta]
    out_ref:  VMEM (1, 16) f32; flat index n encodes (i,j,k,l) as bits 3..0."""
    b = beta_ref[0]

    # Lane iota gives the flat (i,j,k,l) index directly.
    col = jax.lax.broadcasted_iota(jnp.int32, out_ref.shape, 1)
    i = (col >> 3) & 1
    j = (col >> 2) & 1
    k = (col >> 1) & 1
    l = col & 1

    # Transcendentals on the (idle) EUP, f32 throughout (v5e-safe).
    b_vec = jnp.full(out_ref.shape, b, dtype=jnp.float32)
    e_pos = jnp.exp(b_vec)
    e_neg = jnp.exp(-b_vec)
    lam0 = jnp.sqrt(0.5 * (e_pos + e_neg))   # sqrt(cosh(beta))
    lam1 = jnp.sqrt(0.5 * (e_pos - e_neg))   # sqrt(sinh(beta))

    lam_i = jnp.where(i == 1, lam1, lam0)
    lam_j = jnp.where(j == 1, lam1, lam0)
    lam_k = jnp.where(k == 1, lam1, lam0)
    lam_l = jnp.where(l == 1, lam1, lam0)

    parity_even = ((i + j + k + l) & 1) == 0
    val = 2.0 * lam_i * lam_j * lam_k * lam_l
    out_ref[...] = jnp.where(parity_even, val, jnp.zeros_like(val))


@jax.jit
def layer_gen_forward(beta):
    """Pallas equivalent of LayerGen().forward(beta) -> (2,2,2,2) f32 tensor."""
    beta = jnp.asarray(beta, dtype=jnp.float32).reshape(1)

    flat = pl.pallas_call(
        _ising_kernel,
        out_shape=jax.ShapeDtypeStruct((1, 16), jnp.float32),
        in_specs=[pl.BlockSpec(memory_space=pltpu.SMEM)],
        out_specs=pl.BlockSpec((1, 16), lambda: (0, 0)),
    )(beta)
    # Metadata-only reshape of a 16-element f32 array to the contract shape.
    return flat.reshape(2, 2, 2, 2)


def _reference_class_ising(beta):
    beta = float(beta)
    lam = [np.sqrt(np.cosh(beta)), np.sqrt(np.sinh(beta))]
    t = np.zeros((2, 2, 2, 2), dtype=np.float32)
    for i in range(2):
        for j in range(2):
            for k in range(2):
                for l in range(2):
                    if (i + j + k + l) % 2 == 0:
                        t[i, j, k, l] = 2.0 * lam[i] * lam[j] * lam[k] * lam[l]
    return t


if __name__ == "__main__":
    key = jax.random.PRNGKey(0)
    # beta around the critical coupling of the 2D Ising model, deterministic, beta > 0.
    beta = 0.4406868 + 0.1 * jax.random.uniform(key, (), dtype=jnp.float32)

    out = layer_gen_forward(beta)
    out = jax.block_until_ready(out)

    ref = _reference_class_ising(np.asarray(beta))
    assert out.shape == (2, 2, 2, 2) and out.dtype == jnp.float32
    np.testing.assert_allclose(np.asarray(out), ref, rtol=1e-5, atol=1e-6)

    print("KERNEL_OK")
</pallas_src>

<mosaic_0001>
module attributes {stable_mosaic.version = 11 : i64} {
  func.func @_ising_kernel(%arg0: memref<1xf32, #tpu.memory_space<smem>>, %arg1: memref<1x16xf32, #tpu.memory_space<vmem>>) attributes {dimension_semantics = [], scalar_prefetch = 0 : i64, scratch_operands = 0 : i64, tpu.core_type = #tpu.core_type<tc>} {
    %c0 = arith.constant 0 : index
    %0 = memref.load %arg0[%c0] : memref<1xf32, #tpu.memory_space<smem>>
    %1 = tpu.iota {dimensions = array<i32: 1>} : vector<1x16xi32>
    %c3_i32 = arith.constant 3 : i32
    %2 = vector.broadcast %c3_i32 : i32 to vector<1x16xi32>
    %3 = arith.shrsi %1, %2 : vector<1x16xi32>
    %c1_i32 = arith.constant 1 : i32
    %4 = vector.broadcast %c1_i32 : i32 to vector<1x16xi32>
    %5 = arith.andi %3, %4 : vector<1x16xi32>
    %c2_i32 = arith.constant 2 : i32
    %6 = vector.broadcast %c2_i32 : i32 to vector<1x16xi32>
    %7 = arith.shrsi %1, %6 : vector<1x16xi32>
    %c1_i32_0 = arith.constant 1 : i32
    %8 = vector.broadcast %c1_i32_0 : i32 to vector<1x16xi32>
    %9 = arith.andi %7, %8 : vector<1x16xi32>
    %c1_i32_1 = arith.constant 1 : i32
    %10 = vector.broadcast %c1_i32_1 : i32 to vector<1x16xi32>
    %11 = arith.shrsi %1, %10 : vector<1x16xi32>
    %c1_i32_2 = arith.constant 1 : i32
    %12 = vector.broadcast %c1_i32_2 : i32 to vector<1x16xi32>
    %13 = arith.andi %11, %12 : vector<1x16xi32>
    %c1_i32_3 = arith.constant 1 : i32
    %14 = vector.broadcast %c1_i32_3 : i32 to vector<1x16xi32>
    %15 = arith.andi %1, %14 : vector<1x16xi32>
    %16 = vector.broadcast %0 : f32 to vector<1x16xf32>
    %17 = math.exp %16 : vector<1x16xf32>
    %cst = arith.constant 0.000000e+00 : f32
    %18 = vector.broadcast %cst : f32 to vector<1x16xf32>
    %19 = arith.subf %18, %16 : vector<1x16xf32>
    %20 = math.exp %19 : vector<1x16xf32>
    %21 = arith.addf %17, %20 : vector<1x16xf32>
    %cst_4 = arith.constant 5.000000e-01 : f32
    %22 = vector.broadcast %cst_4 : f32 to vector<1x16xf32>
    %23 = arith.mulf %22, %21 : vector<1x16xf32>
    %24 = math.sqrt %23 : vector<1x16xf32>
    %25 = arith.subf %17, %20 : vector<1x16xf32>
    %cst_5 = arith.constant 5.000000e-01 : f32
    %26 = vector.broadcast %cst_5 : f32 to vector<1x16xf32>
    %27 = arith.mulf %26, %25 : vector<1x16xf32>
    %28 = math.sqrt %27 : vector<1x16xf32>
    %c1_i32_6 = arith.constant 1 : i32
    %29 = vector.broadcast %c1_i32_6 : i32 to vector<1x16xi32>
    %30 = arith.cmpi eq, %5, %29 : vector<1x16xi32>
    %31 = arith.select %30, %28, %24 : vector<1x16xi1>, vector<1x16xf32>
    %c1_i32_7 = arith.constant 1 : i32
    %32 = vector.broadcast %c1_i32_7 : i32 to vector<1x16xi32>
    %33 = arith.cmpi eq, %9, %32 : vector<1x16xi32>
    %34 = arith.select %33, %28, %24 : vector<1x16xi1>, vector<1x16xf32>
    %c1_i32_8 = arith.constant 1 : i32
    %35 = vector.broadcast %c1_i32_8 : i32 to vector<1x16xi32>
    %36 = arith.cmpi eq, %13, %35 : vector<1x16xi32>
    %37 = arith.select %36, %28, %24 : vector<1x16xi1>, vector<1x16xf32>
    %c1_i32_9 = arith.constant 1 : i32
    %38 = vector.broadcast %c1_i32_9 : i32 to vector<1x16xi32>
    %39 = arith.cmpi eq, %15, %38 : vector<1x16xi32>
    %40 = arith.select %39, %28, %24 : vector<1x16xi1>, vector<1x16xf32>
    %41 = arith.addi %5, %9 : vector<1x16xi32>
    %42 = arith.addi %41, %13 : vector<1x16xi32>
    %43 = arith.addi %42, %15 : vector<1x16xi32>
    %c1_i32_10 = arith.constant 1 : i32
    %44 = vector.broadcast %c1_i32_10 : i32 to vector<1x16xi32>
    %45 = arith.andi %43, %44 : vector<1x16xi32>
    %c0_i32 = arith.constant 0 : i32
    %46 = vector.broadcast %c0_i32 : i32 to vector<1x16xi32>
    %47 = arith.cmpi eq, %45, %46 : vector<1x16xi32>
    %cst_11 = arith.constant 2.000000e+00 : f32
    %48 = vector.broadcast %cst_11 : f32 to vector<1x16xf32>
    %49 = arith.mulf %48, %31 : vector<1x16xf32>
    %50 = arith.mulf %49, %34 : vector<1x16xf32>
    %51 = arith.mulf %50, %37 : vector<1x16xf32>
    %52 = arith.mulf %51, %40 : vector<1x16xf32>
    %cst_12 = arith.constant 0.000000e+00 : f32
    %53 = vector.broadcast %cst_12 : f32 to vector<1x16xf32>
    %54 = arith.select %47, %52, %53 : vector<1x16xi1>, vector<1x16xf32>
    %c0_13 = arith.constant 0 : index
    %c0_14 = arith.constant 0 : index
    %55 = vector.load %arg1[%c0_13, %c0_14] : memref<1x16xf32, #tpu.memory_space<vmem>>, vector<1x16xf32>
    tpu.vector_store %arg1[%c0_13, %c0_14], %54 {strides = array<i32>} : memref<1x16xf32, #tpu.memory_space<vmem>>, vector<1x16xf32>,
    return
  }
}

</mosaic_0001>

<bundles_post_ra>
// kernel: layer_gen_forward.1
= control target key start
LH: loop header
LB: loop body
LE: loop exit
PB: predicated region body
PF: predicated region fallthrough
CT: control target
= control target key end

     0   :  { %v10_v5 = vlaneseq  ;;  %vm61_vm9 = vcmask 122880   ;;  %s91_s0 = inlined_call_operand.<no memory space> [shape: f32[1], index: 0, kind: input, shape index: {}]   ;;  %s92_s1 = inlined_call_operand.vmem [shape: f32[1,16], index: 1, kind: output, shape index: {}]  }
   0x1   :  { %v19_v0 = vstv %s91_s0 }
   0x2   :  { %v20_v1 = vmul.f32 1.442695, %v19_v0  ;;  %v22_v2 = vsub.f32 0.0, %v19_v0  ;;  %v11_v9 = vand.u32 127, %v10_v5 }
   0x4   :  { %67 = vpow2.f32 %v20_v1  ;;  %v23_v3 = vmul.f32 1.442695, %v22_v2  ;;  %v12_v12 = vshra.s32 %v11_v9, 3  ;;  %v14_v13 = vshra.s32 %v11_v9, 2 }
   0x5   :  { %v16_v16 = vshra.s32 %v11_v9, 1  ;;  %v18_v20 = vand.u32 1, %v11_v9 }
   0x6   :  { %69 = vpow2.f32 %v23_v3  ;;  %v13_v14 = vand.u32 1, %v12_v12  ;;  %v15_v15 = vand.u32 1, %v14_v13 }
   0x7   :  { %v17_v17 = vand.u32 1, %v16_v16  ;;  %vm49_vm7 = vcmp.eq.s32.totalorder %v18_v20, 1 }
   0x8   :  { %v51_v18 = vadd.s32 %v15_v15, %v13_v14  ;;  %vm43_vm4 = vcmp.eq.s32.totalorder %v13_v14, 1  ;;  %vm45_vm5 = vcmp.eq.s32.totalorder %v15_v15, 1 }
   0x9   :  { %vm47_vm6 = vcmp.eq.s32.totalorder %v17_v17, 1 }
   0xa   :  { %v52_v22 = vadd.s32 %v51_v18, %v17_v17 }
   0xc   :  { %v53_v30 = vadd.s32 %v52_v22, %v18_v20 }
   0xe   :  { %v54_v36 = vand.u32 1, %v53_v30 }
  0x10   :  { %vm55_vm8 = vcmp.eq.s32.totalorder %v54_v36, 0 }
  0x11   :  { %v68_v4 = vpop.eup %67 }
  0x13   :  { %v70_v6 = vpop.eup %69 }
  0x14   :  { %v25_v7 = vadd.f32 %v70_v6, %v68_v4  ;;  %v34_v8 = vsub.f32 %v68_v4, %v70_v6 }
  0x16   :  { %v26_v10 = vmul.f32 0.5, %v25_v7  ;;  %v35_v11 = vmul.f32 0.5, %v34_v8 }
  0x18   :  { %71 = vrsqrt.f32 %v26_v10  ;;  %vm29_vm0 = vcmp.eq.f32.partialorder %v26_v10, inf  ;;  %v32_v21 = vand.u32 2147483648, %v26_v10  ;;  %vm31_vm1 = vcmp.eq.f32.partialorder %v26_v10, 0.0 }
  0x19   :  { %73 = vrsqrt.f32 %v35_v11  ;;  %vm38_vm2 = vcmp.eq.f32.partialorder %v35_v11, inf  ;;  %v41_v25 = vand.u32 2147483648, %v35_v11  ;;  %vm40_vm3 = vcmp.eq.f32.partialorder %v35_v11, 0.0 }
  0x25   :  { %v72_v19 = vpop.eup %71 }
  0x26   :  { %v74_v23 = vpop.eup %73  ;;  %v28_v24 = vmul.f32 %v72_v19, %v26_v10 }
  0x27   :  { %v37_v26 = vmul.f32 %v74_v23, %v35_v11 }
  0x28   :  { %v30_v27 = vsel %vm29_vm0, %v26_v10, %v28_v24 }
  0x29   :  { %v33_v28 = vsel %vm31_vm1, %v32_v21, %v30_v27  ;;  %v39_v29 = vsel %vm38_vm2, %v35_v11, %v37_v26 }
  0x2a   :  { %v42_v31 = vsel %vm40_vm3, %v41_v25, %v39_v29 }
  0x2b   :  { %v44_v32 = vsel %vm43_vm4, %v42_v31, %v33_v28  ;;  %v46_v33 = vsel %vm45_vm5, %v42_v31, %v33_v28  ;;  %v48_v35 = vsel %vm47_vm6, %v42_v31, %v33_v28  ;;  %v50_v38 = vsel %vm49_vm7, %v42_v31, %v33_v28 }
  0x2c   :  { %v56_v34 = vmul.f32 2.0, %v44_v32 }
  0x2e   :  { %v57_v37 = vmul.f32 %v56_v34, %v46_v33 }
  0x30   :  { %v58_v39 = vmul.f32 %v57_v37, %v48_v35 }
  0x32   :  { %v59_v40 = vmul.f32 %v58_v39, %v50_v38 }
  0x34   :  { %v60_v41 = vsel %vm55_vm8, %v59_v40, 0.0 }
  0x35   :  { %62 = vst.msk [vmem:[%s92_s1] sm:$0x1] %vm61_vm9, %v60_v41 }

</bundles_post_ra>
